<compile_context>
chip_gen: v7x
topology: tpu7x:2x2x1
jax: 0.10.0
libtpu: 0.0.40
codegen_flags: <defaults>
</compile_context>

<pallas_src>
import functools
import math

import jax
import jax.numpy as jnp
from jax.experimental import pallas as pl
from jax.experimental.pallas import tpu as pltpu

LANE = 128
SUB = 8


def _round_up(x, m):
    return ((x + m - 1) // m) * m


def _pad_last(x, target):
    pad = target - x.shape[-1]
    if pad == 0:
        return x
    return jnp.pad(x, [(0, 0)] * (x.ndim - 1) + [(0, pad)])


def _pad2(w, rows, cols):
    return jnp.pad(w, ((0, rows - w.shape[0]), (0, cols - w.shape[1])))


# --------------------------------- kernel ------------------------------------

def mha_kernel(inq_ref, ink_ref, inv_ref, mask_ref,
               wq_ref, wk_ref, wv_ref, wo_ref, g_ref, b_ref,
               out_ref, *, scale, d_model):
    # Per-batch block (batch dim squeezed): everything is 2-D, no in-kernel reshapes.
    inq = inq_ref[...]                                   # (lq, dm) f32, kept for residual

    # Projections: bf16 operands on the MXU, f32 accumulation.
    q = jnp.dot(inq.astype(jnp.bfloat16), wq_ref[...],
                preferred_element_type=jnp.float32)      # (lq, dqk)
    k = jnp.dot(ink_ref[...], wk_ref[...],
                preferred_element_type=jnp.float32)      # (lk, dqk)
    v = jnp.dot(inv_ref[...], wv_ref[...],
                preferred_element_type=jnp.float32)      # (lk, dv)

    # Fold 1/sqrt(dimk) into q (smaller than the scores tensor at real Lk).
    qb = (q * scale).astype(jnp.bfloat16)
    kb = k.astype(jnp.bfloat16)

    # Scores: contract the last dims directly (no transpose), f32 accumulation.
    scores = jnp.einsum("qd,kd->qk", qb, kb,
                        preferred_element_type=jnp.float32)          # (lq, lk)
    # Padded kv columns are masked (mask padded with 1s in the wrapper) -> math unchanged.
    scores = jnp.where(mask_ref[...] != 0, -1.0e9, scores)

    # Numerically stable softmax in f32; exact reciprocal for tight parity.
    m = jnp.max(scores, axis=-1, keepdims=True)
    p = jnp.exp(scores - m)
    p = p * pl.reciprocal(jnp.sum(p, axis=-1, keepdims=True), approx=False)

    # P @ V and output projection with bf16 operands (flash-style), f32 accumulation.
    ctx = jnp.dot(p.astype(jnp.bfloat16), v.astype(jnp.bfloat16),
                  preferred_element_type=jnp.float32)                # (lq, dv)
    proj = jnp.dot(ctx.astype(jnp.bfloat16), wo_ref[...],
                   preferred_element_type=jnp.float32)               # (lq, dm)

    x = proj + inq                                                   # residual in f32

    # LayerNorm over the real d_model lanes. Padded lanes of x are exactly zero
    # (zero-padded inputQ + zero WO columns), so the mean needs no masking.
    inv_d = 1.0 / float(d_model)
    mean = jnp.sum(x, axis=-1, keepdims=True) * inv_d
    lane = jax.lax.broadcasted_iota(jnp.int32, x.shape, 1)
    diff = jnp.where(lane < d_model, x - mean, 0.0)
    var = jnp.sum(diff * diff, axis=-1, keepdims=True) * inv_d
    out_ref[...] = diff * jax.lax.rsqrt(var + 1e-5) * g_ref[...] + b_ref[...]


# --------------------------------- wrapper ------------------------------------

def multihead_attention(inputQ, inputK, inputV, mask, params, dimk):
    """inputQ/K/V: (N, L, d_model) f32; mask: (N, Lq, Lk) with 1 == masked."""
    N, Lq, d_model = inputQ.shape
    Lk = inputK.shape[1]
    dqh = params["WQ"].shape[1]
    dvh = params["WV"].shape[1]

    dm = _round_up(d_model, LANE)
    dqk = _round_up(dqh, LANE)
    dv = _round_up(dvh, LANE)
    lq = _round_up(Lq, SUB)       # sublane-aligned query rows
    lk = _round_up(Lk, LANE)      # lane-dense kv / scores (padded columns masked below)

    # Activations: zero-pad seq / feature dims (wrapper-side layout plumbing only).
    inq = jnp.pad(inputQ.astype(jnp.float32),
                  ((0, 0), (0, lq - Lq), (0, dm - d_model)))          # f32 (residual path)
    ink = jnp.pad(inputK.astype(jnp.bfloat16),
                  ((0, 0), (0, lk - Lk), (0, dm - d_model)))
    inv = jnp.pad(inputV.astype(jnp.bfloat16),
                  ((0, 0), (0, lk - Lk), (0, dm - d_model)))

    # Mask as int8 (1 == masked); padded q rows / kv columns are masked (value 1).
    mask_i = jnp.pad((mask == 1).astype(jnp.int8),
                     ((0, 0), (0, lq - Lq), (0, lk - Lk)), constant_values=1)

    # Weights in bf16 (native MXU datapath), zero-padded to lane-dense tiles.
    wq = _pad2(params["WQ"].astype(jnp.bfloat16), dm, dqk)
    wk = _pad2(params["WK"].astype(jnp.bfloat16), dm, dqk)
    wv = _pad2(params["WV"].astype(jnp.bfloat16), dm, dv)
    wo = _pad2(params["WO"].astype(jnp.bfloat16), dv, dm)
    g = _pad_last(params["gamma"].astype(jnp.float32), dm).reshape(1, dm)
    b = _pad_last(params["beta"].astype(jnp.float32), dm).reshape(1, dm)

    kernel = functools.partial(mha_kernel,
                               scale=1.0 / math.sqrt(float(dimk)),
                               d_model=d_model)

    def act_spec(rows, cols):
        return pl.BlockSpec((pl.Squeezed(), rows, cols), lambda i: (i, 0, 0))

    def w_spec(rows, cols):
        return pl.BlockSpec((rows, cols), lambda i: (0, 0))   # resident across the grid

    out = pl.pallas_call(
        kernel,
        grid=(N,),
        in_specs=[
            act_spec(lq, dm),          # inputQ  (f32)
            act_spec(lk, dm),          # inputK  (bf16)
            act_spec(lk, dm),          # inputV  (bf16)
            act_spec(lq, lk),          # mask    (int8)
            w_spec(dm, dqk),           # WQ
            w_spec(dm, dqk),           # WK
            w_spec(dm, dv),            # WV
            w_spec(dv, dm),            # WO
            w_spec(1, dm),             # gamma
            w_spec(1, dm),             # beta
        ],
        out_specs=pl.BlockSpec((pl.Squeezed(), lq, dm), lambda i: (i, 0, 0)),
        out_shape=jax.ShapeDtypeStruct((N, lq, dm), jnp.float32),
        compiler_params=pltpu.CompilerParams(
            dimension_semantics=("parallel",),
            vmem_limit_bytes=32 * 1024 * 1024),
    )(inq, ink, inv, mask_i, wq, wk, wv, wo, g, b)

    return out[:, :Lq, :d_model]


# ---------------------------- pure-JAX reference ------------------------------

def _layernorm_ref(x, gamma, beta, eps=1e-5):
    mean = jnp.mean(x, axis=-1, keepdims=True)
    var = jnp.mean((x - mean) ** 2, axis=-1, keepdims=True)
    return (x - mean) * jax.lax.rsqrt(var + eps) * gamma + beta


def _ref_mha(inputQ, inputK, inputV, mask, params, dimk):
    q = inputQ @ params["WQ"]
    k = inputK @ params["WK"]
    v = inputV @ params["WV"]
    s = jnp.einsum("bqd,bkd->bqk", q, k) / jnp.sqrt(jnp.float32(dimk))
    s = jnp.where(mask == 1, -1.0e9, s)
    w = jax.nn.softmax(s, axis=-1) @ v
    y = w @ params["WO"] + inputQ
    return _layernorm_ref(y, params["gamma"], params["beta"])


# ------------------------------------ main ------------------------------------

if __name__ == "__main__":
    d_model, dimq, dimv, n_heads = 32, 8, 8, 4
    N, seq_len = 2, 8

    key = jax.random.PRNGKey(0)
    kx, kq, kk, kv, ko, kg, kb = jax.random.split(key, 7)

    def nrm(k, shape, scale=0.05):
        return (scale * jax.random.normal(k, shape)).astype(jnp.float32)

    params = {
        "WQ": nrm(kq, (d_model, dimq * n_heads)),
        "WK": nrm(kk, (d_model, dimq * n_heads)),
        "WV": nrm(kv, (d_model, dimv * n_heads)),
        "WO": nrm(ko, (dimv * n_heads, d_model)),
        "gamma": (1.0 + 0.1 * jax.random.normal(kg, (d_model,))).astype(jnp.float32),
        "beta": (0.1 * jax.random.normal(kb, (d_model,))).astype(jnp.float32),
    }

    x = jax.random.normal(kx, (N, seq_len, d_model), dtype=jnp.float32)
    # causal mask, 1 == masked (matches `scores[mask == 1] = -1e9` in the PyTorch module)
    mask = jnp.broadcast_to(
        jnp.triu(jnp.ones((seq_len, seq_len), jnp.float32), k=1)[None],
        (N, seq_len, seq_len))

    out = multihead_attention(x, x, x, mask, params, dimq)
    out = jax.block_until_ready(out)

    ref = _ref_mha(x, x, x, mask, params, dimq)
    assert out.shape == (N, seq_len, d_model)
    err = jnp.max(jnp.abs(out - ref))
    # Tolerance accounts for bf16 MXU operands (f32 accumulation, f32 softmax/LayerNorm).
    assert jnp.allclose(out, ref, rtol=5e-3, atol=5e-3), f"mismatch vs reference, max err {err}"
    print("KERNEL_OK")
</pallas_src>

<mosaic_0001>
module attributes {stable_mosaic.version = 11 : i64} {
  func.func @mha_kernel(%arg0: i32, %arg1: memref<1x8x128xf32, #tpu.memory_space<vmem>>, %arg2: memref<1x128x128xbf16, #tpu.memory_space<vmem>>, %arg3: memref<1x128x128xbf16, #tpu.memory_space<vmem>>, %arg4: memref<1x8x128xi8, #tpu.memory_space<vmem>>, %arg5: memref<128x128xbf16, #tpu.memory_space<vmem>>, %arg6: memref<128x128xbf16, #tpu.memory_space<vmem>>, %arg7: memref<128x128xbf16, #tpu.memory_space<vmem>>, %arg8: memref<128x128xbf16, #tpu.memory_space<vmem>>, %arg9: memref<1x128xf32, #tpu.memory_space<vmem>>, %arg10: memref<1x128xf32, #tpu.memory_space<vmem>>, %arg11: memref<1x8x128xf32, #tpu.memory_space<vmem>>) attributes {dimension_semantics = [#tpu.dimension_semantics<parallel>], iteration_bounds = array<i64: 2>, scalar_prefetch = 0 : i64, scratch_operands = 0 : i64, tpu.core_type = #tpu.core_type<tc>, window_params = [{transform_indices = @transform_0, window_bounds = array<i64: 1, 8, 128>}, {transform_indices = @transform_1, window_bounds = array<i64: 1, 128, 128>}, {transform_indices = @transform_2, window_bounds = array<i64: 1, 128, 128>}, {transform_indices = @transform_3, window_bounds = array<i64: 1, 8, 128>}, {pipeline_mode = #tpu.pipeline_mode<synchronous>, transform_indices = @transform_4, window_bounds = array<i64: 128, 128>}, {pipeline_mode = #tpu.pipeline_mode<synchronous>, transform_indices = @transform_5, window_bounds = array<i64: 128, 128>}, {pipeline_mode = #tpu.pipeline_mode<synchronous>, transform_indices = @transform_6, window_bounds = array<i64: 128, 128>}, {pipeline_mode = #tpu.pipeline_mode<synchronous>, transform_indices = @transform_7, window_bounds = array<i64: 128, 128>}, {pipeline_mode = #tpu.pipeline_mode<synchronous>, transform_indices = @transform_8, window_bounds = array<i64: 1, 128>}, {pipeline_mode = #tpu.pipeline_mode<synchronous>, transform_indices = @transform_9, window_bounds = array<i64: 1, 128>}, {transform_indices = @transform_10, window_bounds = array<i64: 1, 8, 128>}]} {
    %c0 = arith.constant 0 : index
    %c0_0 = arith.constant 0 : index
    %c0_1 = arith.constant 0 : index
    %0 = vector.load %arg1[%c0, %c0_0, %c0_1] : memref<1x8x128xf32, #tpu.memory_space<vmem>>, vector<1x8x128xf32>
    %1 = vector.shape_cast %0 : vector<1x8x128xf32> to vector<8x128xf32>
    %2 = arith.truncf %1 : vector<8x128xf32> to vector<8x128xbf16>
    %c0_2 = arith.constant 0 : index
    %c0_3 = arith.constant 0 : index
    %3 = vector.load %arg5[%c0_2, %c0_3] : memref<128x128xbf16, #tpu.memory_space<vmem>>, vector<128x128xbf16>
    %cst = arith.constant dense<0.000000e+00> : vector<8x128xf32>
    %4 = tpu.matmul %2, %3, %cst {dimension_numbers = #tpu.dot_dimension_numbers<[1], [0], [0], [1], [0, 0, 1, 1], [], []>} : vector<8x128xbf16>, vector<128x128xbf16>, vector<8x128xf32> -> vector<8x128xf32>
    %c0_4 = arith.constant 0 : index
    %c0_5 = arith.constant 0 : index
    %c0_6 = arith.constant 0 : index
    %5 = vector.load %arg2[%c0_4, %c0_5, %c0_6] : memref<1x128x128xbf16, #tpu.memory_space<vmem>>, vector<1x128x128xbf16>
    %6 = vector.shape_cast %5 : vector<1x128x128xbf16> to vector<128x128xbf16>
    %c0_7 = arith.constant 0 : index
    %c0_8 = arith.constant 0 : index
    %7 = vector.load %arg6[%c0_7, %c0_8] : memref<128x128xbf16, #tpu.memory_space<vmem>>, vector<128x128xbf16>
    %cst_9 = arith.constant dense<0.000000e+00> : vector<128x128xf32>
    %8 = tpu.matmul %6, %7, %cst_9 {dimension_numbers = #tpu.dot_dimension_numbers<[1], [0], [0], [1], [0, 0, 1, 1], [], []>} : vector<128x128xbf16>, vector<128x128xbf16>, vector<128x128xf32> -> vector<128x128xf32>
    %c0_10 = arith.constant 0 : index
    %c0_11 = arith.constant 0 : index
    %c0_12 = arith.constant 0 : index
    %9 = vector.load %arg3[%c0_10, %c0_11, %c0_12] : memref<1x128x128xbf16, #tpu.memory_space<vmem>>, vector<1x128x128xbf16>
    %10 = vector.shape_cast %9 : vector<1x128x128xbf16> to vector<128x128xbf16>
    %c0_13 = arith.constant 0 : index
    %c0_14 = arith.constant 0 : index
    %11 = vector.load %arg7[%c0_13, %c0_14] : memref<128x128xbf16, #tpu.memory_space<vmem>>, vector<128x128xbf16>
    %cst_15 = arith.constant dense<0.000000e+00> : vector<128x128xf32>
    %12 = tpu.matmul %10, %11, %cst_15 {dimension_numbers = #tpu.dot_dimension_numbers<[1], [0], [0], [1], [0, 0, 1, 1], [], []>} : vector<128x128xbf16>, vector<128x128xbf16>, vector<128x128xf32> -> vector<128x128xf32>
    %cst_16 = arith.constant 0.353553385 : f32
    %13 = vector.broadcast %cst_16 : f32 to vector<8x128xf32>
    %14 = arith.mulf %4, %13 : vector<8x128xf32>
    %15 = arith.truncf %14 : vector<8x128xf32> to vector<8x128xbf16>
    %16 = arith.truncf %8 : vector<128x128xf32> to vector<128x128xbf16>
    "tpu.trace_start"() <{level = 10 : i32, message = "qd,kd->qk"}> : () -> ()
    %cst_17 = arith.constant dense<0.000000e+00> : vector<8x128xf32>
    %17 = tpu.matmul %15, %16, %cst_17 {dimension_numbers = #tpu.dot_dimension_numbers<[1], [1], [0], [0], [0, 0, 1, 0], [], []>} : vector<8x128xbf16>, vector<128x128xbf16>, vector<8x128xf32> -> vector<8x128xf32>
    "tpu.trace_stop"() : () -> ()
    %c0_18 = arith.constant 0 : index
    %c0_19 = arith.constant 0 : index
    %c0_20 = arith.constant 0 : index
    %18 = vector.load %arg4[%c0_18, %c0_19, %c0_20] : memref<1x8x128xi8, #tpu.memory_space<vmem>>, vector<1x8x128xi8>
    %19 = vector.shape_cast %18 : vector<1x8x128xi8> to vector<8x128xi8>
    %c0_i8 = arith.constant 0 : i8
    %20 = vector.broadcast %c0_i8 : i8 to vector<8x128xi8>
    %21 = arith.cmpi ne, %19, %20 : vector<8x128xi8>
    %cst_21 = arith.constant -1.000000e+09 : f32
    %22 = vector.broadcast %cst_21 : f32 to vector<8x128xf32>
    %23 = arith.select %21, %22, %17 : vector<8x128xi1>, vector<8x128xf32>
    %cst_22 = arith.constant dense<0xFF800000> : vector<8xf32>
    %24 = vector.multi_reduction <maximumf>, %23, %cst_22 [1] : vector<8x128xf32> to vector<8xf32>
    %25 = vector.shape_cast %24 : vector<8xf32> to vector<8x1xf32>
    %26 = vector.broadcast %25 : vector<8x1xf32> to vector<8x128xf32>
    %27 = arith.subf %23, %26 : vector<8x128xf32>
    %28 = math.exp %27 : vector<8x128xf32>
    %cst_23 = arith.constant dense<0.000000e+00> : vector<8xf32>
    %29 = vector.multi_reduction <add>, %28, %cst_23 [1] : vector<8x128xf32> to vector<8xf32>
    %30 = vector.shape_cast %29 : vector<8xf32> to vector<8x1xf32>
    %31 = tpu.reciprocal %30 : vector<8x1xf32> -> vector<8x1xf32>
    %32 = vector.broadcast %31 : vector<8x1xf32> to vector<8x128xf32>
    %33 = arith.mulf %28, %32 : vector<8x128xf32>
    %34 = arith.truncf %33 : vector<8x128xf32> to vector<8x128xbf16>
    %35 = arith.truncf %12 : vector<128x128xf32> to vector<128x128xbf16>
    %cst_24 = arith.constant dense<0.000000e+00> : vector<8x128xf32>
    %36 = tpu.matmul %34, %35, %cst_24 {dimension_numbers = #tpu.dot_dimension_numbers<[1], [0], [0], [1], [0, 0, 1, 1], [], []>} : vector<8x128xbf16>, vector<128x128xbf16>, vector<8x128xf32> -> vector<8x128xf32>
    %37 = arith.truncf %36 : vector<8x128xf32> to vector<8x128xbf16>
    %c0_25 = arith.constant 0 : index
    %c0_26 = arith.constant 0 : index
    %38 = vector.load %arg8[%c0_25, %c0_26] : memref<128x128xbf16, #tpu.memory_space<vmem>>, vector<128x128xbf16>
    %cst_27 = arith.constant dense<0.000000e+00> : vector<8x128xf32>
    %39 = tpu.matmul %37, %38, %cst_27 {dimension_numbers = #tpu.dot_dimension_numbers<[1], [0], [0], [1], [0, 0, 1, 1], [], []>} : vector<8x128xbf16>, vector<128x128xbf16>, vector<8x128xf32> -> vector<8x128xf32>
    %40 = arith.addf %39, %1 : vector<8x128xf32>
    %cst_28 = arith.constant dense<0.000000e+00> : vector<8xf32>
    %41 = vector.multi_reduction <add>, %40, %cst_28 [1] : vector<8x128xf32> to vector<8xf32>
    %42 = vector.shape_cast %41 : vector<8xf32> to vector<8x1xf32>
    %cst_29 = arith.constant 3.125000e-02 : f32
    %43 = vector.broadcast %cst_29 : f32 to vector<8x1xf32>
    %44 = arith.mulf %42, %43 : vector<8x1xf32>
    %45 = tpu.iota {dimensions = array<i32: 1>} : vector<8x128xi32>
    %c32_i32 = arith.constant 32 : i32
    %46 = vector.broadcast %c32_i32 : i32 to vector<8x128xi32>
    %47 = arith.cmpi slt, %45, %46 : vector<8x128xi32>
    %48 = vector.broadcast %44 : vector<8x1xf32> to vector<8x128xf32>
    %49 = arith.subf %40, %48 : vector<8x128xf32>
    %cst_30 = arith.constant 0.000000e+00 : f32
    %50 = vector.broadcast %cst_30 : f32 to vector<8x128xf32>
    %51 = arith.select %47, %49, %50 : vector<8x128xi1>, vector<8x128xf32>
    %52 = arith.mulf %51, %51 : vector<8x128xf32>
    %cst_31 = arith.constant dense<0.000000e+00> : vector<8xf32>
    %53 = vector.multi_reduction <add>, %52, %cst_31 [1] : vector<8x128xf32> to vector<8xf32>
    %54 = vector.shape_cast %53 : vector<8xf32> to vector<8x1xf32>
    %cst_32 = arith.constant 3.125000e-02 : f32
    %55 = vector.broadcast %cst_32 : f32 to vector<8x1xf32>
    %56 = arith.mulf %54, %55 : vector<8x1xf32>
    %cst_33 = arith.constant 9.99999974E-6 : f32
    %57 = vector.broadcast %cst_33 : f32 to vector<8x1xf32>
    %58 = arith.addf %56, %57 : vector<8x1xf32>
    %59 = math.rsqrt %58 : vector<8x1xf32>
    %60 = vector.broadcast %59 : vector<8x1xf32> to vector<8x128xf32>
    %61 = arith.mulf %51, %60 : vector<8x128xf32>
    %c0_34 = arith.constant 0 : index
    %c0_35 = arith.constant 0 : index
    %62 = vector.load %arg9[%c0_34, %c0_35] : memref<1x128xf32, #tpu.memory_space<vmem>>, vector<1x128xf32>
    %63 = vector.broadcast %62 : vector<1x128xf32> to vector<8x128xf32>
    %64 = arith.mulf %61, %63 : vector<8x128xf32>
    %c0_36 = arith.constant 0 : index
    %c0_37 = arith.constant 0 : index
    %65 = vector.load %arg10[%c0_36, %c0_37] : memref<1x128xf32, #tpu.memory_space<vmem>>, vector<1x128xf32>
    %66 = vector.broadcast %65 : vector<1x128xf32> to vector<8x128xf32>
    %67 = arith.addf %64, %66 : vector<8x128xf32>
    %c0_38 = arith.constant 0 : index
    %c0_39 = arith.constant 0 : index
    %c0_40 = arith.constant 0 : index
    %68 = vector.load %arg11[%c0_38, %c0_39, %c0_40] : memref<1x8x128xf32, #tpu.memory_space<vmem>>, vector<1x8x128xf32>
    %69 = vector.shape_cast %68 : vector<1x8x128xf32> to vector<8x128xf32>
    %70 = vector.shape_cast %67 : vector<8x128xf32> to vector<1x8x128xf32>
    tpu.vector_store %arg11[%c0_38, %c0_39, %c0_40], %70 {strides = array<i32>} : memref<1x8x128xf32, #tpu.memory_space<vmem>>, vector<1x8x128xf32>,
    return
  }
  func.func @transform_0(%arg0: i32) -> (i32, i32, i32) {
    %c0_i32 = arith.constant 0 : i32
    %c0_i32_0 = arith.constant 0 : i32
    %c0_i32_1 = arith.constant 0 : i32
    return %arg0, %c0_i32, %c0_i32_0 : i32, i32, i32
  }
  func.func @transform_1(%arg0: i32) -> (i32, i32, i32) {
    %c0_i32 = arith.constant 0 : i32
    %c0_i32_0 = arith.constant 0 : i32
    %c0_i32_1 = arith.constant 0 : i32
    return %arg0, %c0_i32, %c0_i32_0 : i32, i32, i32
  }
  func.func @transform_2(%arg0: i32) -> (i32, i32, i32) {
    %c0_i32 = arith.constant 0 : i32
    %c0_i32_0 = arith.constant 0 : i32
    %c0_i32_1 = arith.constant 0 : i32
    return %arg0, %c0_i32, %c0_i32_0 : i32, i32, i32
  }
  func.func @transform_3(%arg0: i32) -> (i32, i32, i32) {
    %c0_i32 = arith.constant 0 : i32
    %c0_i32_0 = arith.constant 0 : i32
    %c0_i32_1 = arith.constant 0 : i32
    return %arg0, %c0_i32, %c0_i32_0 : i32, i32, i32
  }
  func.func @transform_4(%arg0: i32) -> (i32, i32) {
    %c0_i32 = arith.constant 0 : i32
    %c0_i32_0 = arith.constant 0 : i32
    %c0_i32_1 = arith.constant 0 : i32
    return %c0_i32, %c0_i32_0 : i32, i32
  }
  func.func @transform_5(%arg0: i32) -> (i32, i32) {
    %c0_i32 = arith.constant 0 : i32
    %c0_i32_0 = arith.constant 0 : i32
    %c0_i32_1 = arith.constant 0 : i32
    return %c0_i32, %c0_i32_0 : i32, i32
  }
  func.func @transform_6(%arg0: i32) -> (i32, i32) {
    %c0_i32 = arith.constant 0 : i32
    %c0_i32_0 = arith.constant 0 : i32
    %c0_i32_1 = arith.constant 0 : i32
    return %c0_i32, %c0_i32_0 : i32, i32
  }
  func.func @transform_7(%arg0: i32) -> (i32, i32) {
    %c0_i32 = arith.constant 0 : i32
    %c0_i32_0 = arith.constant 0 : i32
    %c0_i32_1 = arith.constant 0 : i32
    return %c0_i32, %c0_i32_0 : i32, i32
  }
  func.func @transform_8(%arg0: i32) -> (i32, i32) {
    %c0_i32 = arith.constant 0 : i32
    %c0_i32_0 = arith.constant 0 : i32
    %c0_i32_1 = arith.constant 0 : i32
    return %c0_i32, %c0_i32_0 : i32, i32
  }
  func.func @transform_9(%arg0: i32) -> (i32, i32) {
    %c0_i32 = arith.constant 0 : i32
    %c0_i32_0 = arith.constant 0 : i32
    %c0_i32_1 = arith.constant 0 : i32
    return %c0_i32, %c0_i32_0 : i32, i32
  }
  func.func @transform_10(%arg0: i32) -> (i32, i32, i32) {
    %c0_i32 = arith.constant 0 : i32
    %c0_i32_0 = arith.constant 0 : i32
    %c0_i32_1 = arith.constant 0 : i32
    return %arg0, %c0_i32, %c0_i32_0 : i32, i32, i32
  }
}

</mosaic_0001>

<bundles_post_ra>
// kernel: tpu_custom_call.1
= control target key start
LH: loop header
LB: loop body
LE: loop exit
PB: predicated region body
PF: predicated region fallthrough
CT: control target
= control target key end

     0   :  { %s2756_s0 = inlined_call_operand.hbm [shape: f32[2,8,128], index: 0, kind: input, shape index: {}]   ;;  %s2757_s1 = inlined_call_operand.hbm [shape: bf16[2,128,128], index: 1, kind: input, shape index: {}]   ;;  %s2758_s2 = inlined_call_operand.hbm [shape: bf16[2,128,128], index: 2, kind: input, shape index: {}]   ;;  %s2759_s3 = inlined_call_operand.vmem [shape: s8[2,8,128], index: 3, kind: input, shape index: {}]   ;;  %s2760_s4 = inlined_call_operand.hbm [shape: bf16[128,128], index: 4, kind: input, shape index: {}]   ;;  %s2761_s5 = inlined_call_operand.hbm [shape: bf16[128,128], index: 5, kind: input, shape index: {}]   ;;  %s2762_s6 = inlined_call_operand.hbm [shape: bf16[128,128], index: 6, kind: input, shape index: {}]   ;;  %s2763_s7 = inlined_call_operand.hbm [shape: bf16[128,128], index: 7, kind: input, shape index: {}]   ;;  %s2764_s8 = inlined_call_operand.vmem [shape: f32[1,128], index: 8, kind: input, shape index: {}]   ;;  %s2765_s9 = inlined_call_operand.vmem [shape: f32[1,128], index: 9, kind: input, shape index: {}]   ;;  %s2766_s10 = inlined_call_operand.hbm [shape: f32[2,8,128], index: 10, kind: output, shape index: {}]  }
   0x1   :  { %2792 = sst [smem:[#allocation26_spill]] %s2757_s1 }
   0x2   :  { %2793 = sst [smem:[#allocation27_spill]] %s2759_s3 }
   0x3   :  { %2794 = sst [smem:[#allocation28_spill]] %s2760_s4 }
   0x4   :  { %2795 = sst [smem:[#allocation29_spill]] %s2762_s6 }
   0x5   :  { %2796 = sst [smem:[#allocation30_spill]] %s2764_s8 }
   0x6   :  { %2797 = sst [smem:[#allocation31_spill]] %s2765_s9 }
   0x7   :  { %2798 = sst [smem:[#allocation32_spill]] %s2766_s10 }
   0x8   :  { %15 = vsyncpa [#allocation3], 0 }
   0x9   :  { %17 = vsyncpa [#allocation3 + $0x1], 0 }
   0xa   :  { %18 = vsyncpa [#allocation6], 0 }
   0xb   :  { %20 = vsyncpa [#allocation6 + $0x1], 0 }
   0xc   :  { %21 = vsyncpa [#allocation9], 0 }
   0xd   :  { %22 = vsyncpa [#allocation12], 0 }
   0xe   :  { %23 = vsyncpa [#allocation4], 0 }
   0xf   :  { %25 = vsyncpa [#allocation4 + $0x1], 0  ;;  %s2313_s13 = smov 0   ;;  %s2315_s14 = smov 0  }
  0x10   :  { %s2317_s15 = smov 0   ;;  %s2319_s16 = smov 0  }
  0x11 LB: > { %2799 = sst [smem:[#allocation20_spill]] %s2231_s13  ;;  %s2334_s17 = sadd.s32 4294967295, %s2243_s16   ;;  %s2243_s16 = sphi %s2319_s16, %s2840_s16   ;;  %s2239_s15 = sphi %s2317_s15, %s2842_s15   ;;  %s2235_s14 = sphi %s2315_s14, %s2844_s14   ;;  %s2231_s13 = sphi %s2313_s13, %s2843_s13  }
  0x12   : > { %2800 = sst [smem:[#allocation21_spill]] %s2239_s15  ;;  %s1514_s18 = sadd.s32 4294967294, %s2243_s16  }
  0x13   : > { %p51_p0 = scmp.ne.s32.totalorder %s2235_s14, %s2231_s13  ;;  %p2767_p1 = scmp.eq.s32.totalorder %s2334_s17, 0 }
  0x14   : > { %p285_p3 = scmp.eq.s32.totalorder %s1514_s18, 1  ;;  %p1515_p5 = scmp.ge.s32.totalorder %s2243_s16, 1 }
  0x15   : > { %p2343_p4 = por %p2767_p1, %p51_p0  ;;  %p292_p7 = scmp.lt.s32.totalorder %s2243_s16, 3 }
  0x16   : > { %p2348_p6 = por %p285_p3, %p51_p0  ;;  %s2245_s22 = smov [#allocation8]  }
  0x17   : > { %s2801_s19 = scalar_select %p2343_p4, 1, 0 }
  0x18   : > { %s2802_s20 = scalar_select %p2348_p6, 1, 0 }
  0x19   : > { %p2353_p8 = pnand %p1515_p5, %p292_p7  ;;  %s304_s23 = sshll.u32 %s2245_s22, 4  ;;  %s2357_s23 = int_to_ptr.vmem [resolvable:$true] %s304_s23 }
  0x1a   : > { %2803 = sst [smem:[#allocation22_spill]] %s2802_s20  ;;  %s2246_s25 = smov [#allocation11]  }
  0x1b   : > { %s2804_s21 = scalar_select %p2353_p8, 1, 0 }
  0x1c   : > { %p1831_p9 = pneg %p2353_p8  ;;  %s330_s26 = sshll.u32 %s2246_s25, 4  ;;  %s2368_s26 = int_to_ptr.vmem [resolvable:$true] %s330_s26 }
  0x1d   : > { %s2806_s4 = sld [smem:[#allocation28_spill]] }
  0x1e   : > { %p2364_p11 = pnand %p1831_p9, %p2767_p1 }
  0x20   : > { %s2805_s24 = scalar_select %p2364_p11, 1, 0 }
  0x21   : > { %p2378_p13 = pneg %p2364_p11 }
  0x23   : > { %s1963_s29 = scalar_lea.hbm %s2806_s4, 1024 }
  0x24   : > { %p1964_p12 = scmp.ne.s32.totalorder %s2806_s4, %s1963_s29  ;;  %p1970_p5 = scmp.lt.u32.totalorder %s1963_s29, %s2806_s4 }
  0x25   : > { %s2807_s12 = scalar_select %p2378_p13, 1, 0 }
  0x26   : > { %p1966_p0 = pnand %p2378_p13, %p1964_p12 }
  0x28   : > { %p1967_p3 = pneg %p1966_p0 }
  0x2a   : > { %p1972_p7 = pnand %p1970_p5, %p1967_p3 }
  0x2c   : > { %1975 = shalt.err (!%p1972_p7)
}
  0x2d   : > { %s1976_s25 = scalar_lea.vmem %s2357_s23, 1024  ;;  %p1984_p2 = scmp.lt.s32.totalorder %s2357_s23, %s2357_s23 }
  0x2e   : > { %p1977_p9 = scmp.ne.s32.totalorder %s2357_s23, %s1976_s25  ;;  %p1985_p6 = scmp.lt.s32.totalorder %s1976_s25, %s1976_s25 }
  0x30   : > { %p1979_p10 = pnand %p1977_p9, %p2378_p13  ;;  %p1986_p12 = por %p1985_p6, %p1984_p2 }
  0x32   : > { %p1980_p1 = pneg %p1979_p10 }
  0x34   : > { %p1987_p0 = pnand %p1986_p12, %p1980_p1 }
  0x36   : > { %1990 = shalt.err (!%p1987_p0)
}
  0x37   : > { %s2771_s27 = smov 64   ;;  %s2773_s28 = smov 4  }
  0x38   : > { %1834 = dma.hbm_to_vmem [thread:$0]  (!%p2364_p11), %s2806_s4, 1024, %s2357_s23, [#allocation9], %s2771_s27, %s2771_s27, %s2773_s28  }
  0x39   : > { %s2808_s6 = sld [smem:[#allocation29_spill]] }
  0x3f   : > { %s1991_s22 = scalar_lea.hbm %s2808_s6, 1024 }
  0x40   : > { %p1992_p1 = scmp.ne.s32.totalorder %s2808_s6, %s1991_s22  ;;  %p1998_p10 = scmp.lt.u32.totalorder %s1991_s22, %s2808_s6 }
  0x42   : > { %p1994_p2 = pnand %p1992_p1, %p2378_p13 }
  0x44   : > { %p1995_p6 = pneg %p1994_p2 }
  0x46   : > { %p2000_p3 = pnand %p1998_p10, %p1995_p6 }
  0x48   : > { %2003 = shalt.err (!%p2000_p3)
}
  0x49   : > { %s2004_s23 = scalar_lea.vmem %s2368_s26, 1024  ;;  %p2012_p12 = scmp.lt.s32.totalorder %s2368_s26, %s2368_s26 }
  0x4a   : > { %p2005_p5 = scmp.ne.s32.totalorder %s2368_s26, %s2004_s23  ;;  %p2013_p0 = scmp.lt.s32.totalorder %s2004_s23, %s2004_s23 }
  0x4c   : > { %p2007_p7 = pnand %p2005_p5, %p2378_p13  ;;  %p2014_p1 = por %p2013_p0, %p2012_p12 }
  0x4e   : > { %p2008_p9 = pneg %p2007_p7 }
  0x50   : > { %p2015_p2 = pnand %p2014_p1, %p2008_p9 }
  0x52   : > { %2018 = shalt.err (!%p2015_p2)
}
  0x53   : > { %1840 = dma.hbm_to_vmem [thread:$0]  (!%p2364_p11), %s2808_s6, 1024, %s2368_s26, [#allocation12], %s2771_s27, %s2771_s27, %s2773_s28  }
  0x54   : > { %s2429_s20 = sadd.s32 1, %s2243_s16   ;;  %s38_s29 = sadd.s32 1, %s2239_s15 }
  0x55   : > { %2809 = sst [smem:[#allocation23_spill]] %s2429_s20  ;;  %s35_s30 = ssub.s32 %s2243_s16, %s2429_s20 }
  0x56   : > { %p45_p6 = scmp.ne.s32.totalorder %s2239_s15, %s2235_s14  ;;  %p36_p10 = scmp.eq.s32.totalorder %s35_s30, 0 }
  0x57   : > { %p46_p3 = scmp.eq.s32.totalorder %s2243_s16, 0  ;;  %p2810_p5 = scmp.eq.s32.totalorder %s2334_s17, 1 }
  0x58   : > { %p1862_p9 = scmp.lt.s32.totalorder %s2243_s16, 2  ;;  %s2448_s22 = sand.u32 1, %s2239_s15  }
  0x59   : > { %p2439_p7 = por %p2810_p5, %p45_p6  ;;  %p47_p12 = por %p46_p3, %p45_p6 }
  0x5a   : > { %s2445_s18 = scalar_select %p36_p10, %s2239_s15, %s38_s29  }
  0x5b   : > { %s2811_s11 = scalar_select %p2439_p7, 1, 0 }
  0x5c   : > { %2813 = sst [smem:[#allocation25_spill]] %s2445_s18  ;;  %s381_s26 = sand.u32 1, %s2243_s16  }
  0x5d   : > { %2812 = sst [smem:[#allocation24_spill]] %s2811_s11  ;;  %s2778_s25 = sshll.u32 %s2448_s22, 6 }
  0x5e   : > { %p2452_p0 = pnand %p1862_p9, %p47_p12  ;;  %s1593_s10 = sshll.u32 %s2243_s16, 10 }
  0x5f   : > { %s2815_s1 = sld [smem:[#allocation26_spill]]  ;;  %s385_s29 = scalar_lea.vmem [#allocation5], %s2778_s25 }
  0x60   : > { %s2814_s23 = scalar_select %p2452_p0, 1, 0 }
  0x61   : > { %s392_s28 = sshll.u32 %s385_s29, 4  ;;  %s2469_s18 = scalar_lea.hbm %s2758_s2, %s1593_s10  ;;  %s2464_s28 = int_to_ptr.vmem [resolvable:$true] %s392_s28 }
  0x62   : > { %s2471_s15 = scalar_lea.sflag [#allocation6], %s381_s26  ;;  %p2477_p2 = pneg %p2452_p0 }
  0x64   : > { %s2816_s13 = scalar_select %p2477_p2, 1, 0 }
  0x65   : > { %s2460_s27 = scalar_lea.hbm %s2815_s1, %s1593_s10  ;;  %s2024_s25 = scalar_lea.hbm %s2815_s1, 2048 }
  0x66   : > { %s2019_s20 = scalar_lea.hbm %s2460_s27, 1024  ;;  %p2025_p3 = scmp.lt.u32.totalorder %s2460_s27, %s2815_s1 }
  0x67   : > { %p2020_p1 = scmp.ne.s32.totalorder %s2460_s27, %s2019_s20  ;;  %p2026_p5 = scmp.lt.u32.totalorder %s2024_s25, %s2019_s20 }
  0x68   : > { %p2028_p12 = scmp.lt.u32.totalorder %s2019_s20, %s2460_s27 }
  0x69   : > { %p2022_p6 = pnand %p2477_p2, %p2020_p1  ;;  %p2027_p9 = por %p2026_p5, %p2025_p3 }
  0x6b   : > { %p2023_p10 = pneg %p2022_p6  ;;  %p2029_p7 = por %p2028_p12, %p2027_p9 }
  0x6d   : > { %p2030_p4 = pnand %p2029_p7, %p2023_p10 }
  0x6f   : > { %2033 = shalt.err (!%p2030_p4)
}
  0x70   : > { %s2034_s26 = scalar_lea.vmem %s2464_s28, 1024  ;;  %s2249_s10 = smov [#allocation5]  }
  0x71   : > { %p2035_p1 = scmp.ne.s32.totalorder %s2464_s28, %s2034_s26  ;;  %s2039_s30 = sshll.u32 %s2249_s10, 4  ;;  %s2040_s30 = int_to_ptr.vmem [resolvable:$false] %s2039_s30 }
  0x72   : > { %s2041_s29 = scalar_lea.vmem %s2040_s30, 2048  ;;  %p2042_p11 = scmp.lt.s32.totalorder %s2464_s28, %s2040_s30 }
  0x73   : > { %p2037_p6 = pnand %p2035_p1, %p2477_p2  ;;  %p2043_p13 = scmp.lt.s32.totalorder %s2041_s29, %s2034_s26 }
  0x75   : > { %p2038_p8 = pneg %p2037_p6  ;;  %p2044_p3 = por %p2043_p13, %p2042_p11 }
  0x77   : > { %p2045_p5 = pnand %p2044_p3, %p2038_p8 }
  0x79   : > { %2048 = shalt.err (!%p2045_p5)
}
  0x7a   : > { %s2817_s20 = smov 4   ;;  %s2818_s25 = smov 64  }
  0x7b   : > { %1850 = dma.hbm_to_vmem [thread:$0]  (!%p2452_p0), %s2460_s27, 1024, %s2464_s28, %s2471_s15, %s2818_s25, %s2818_s25, %s2817_s20  }
  0x7c   : > { %s2819_s4 = sshll.u32 %s2448_s22, 6  ;;  %s2250_s26 = smov [#allocation10]  }
  0x7d   : > { %s406_s6 = scalar_lea.vmem [#allocation7], %s2819_s4  ;;  %s317_s30 = sshll.u32 %s2250_s26, 4  ;;  %s318_s30 = int_to_ptr.vmem [resolvable:$true] %s317_s30 }
  0x7e   : > { %s413_s10 = sshll.u32 %s406_s6, 4  ;;  %s2049_s9 = scalar_lea.hbm %s2761_s5, 1024  ;;  %s2506_s10 = int_to_ptr.vmem [resolvable:$true] %s413_s10 }
  0x7f   : > { %p2050_p4 = scmp.ne.s32.totalorder %s2761_s5, %s2049_s9  ;;  %p2820_p8 = scmp.ne.s32.totalorder %s2807_s12, 0 }
  0x80   : > { %p2056_p7 = scmp.lt.u32.totalorder %s2049_s9, %s2761_s5 }
  0x81   : > { %p2052_p11 = pnand %p2050_p4, %p2820_p8 }
  0x83   : > { %p2053_p13 = pneg %p2052_p11 }
  0x85   : > { %p2058_p10 = pnand %p2056_p7, %p2053_p13 }
  0x87   : > { %2061 = shalt.err (!%p2058_p10)
}
  0x88   : > { %s2062_s4 = scalar_lea.vmem %s318_s30, 1024  ;;  %p2070_p6 = scmp.lt.s32.totalorder %s318_s30, %s318_s30 }
  0x89   : > { %p2063_p9 = scmp.ne.s32.totalorder %s318_s30, %s2062_s4  ;;  %p2071_p3 = scmp.lt.s32.totalorder %s2062_s4, %s2062_s4 }
  0x8b   : > { %p2065_p12 = pnand %p2063_p9, %p2820_p8  ;;  %p2072_p5 = por %p2071_p3, %p2070_p6 }
  0x8d   : > { %p2066_p1 = pneg %p2065_p12 }
  0x8f   : > { %p2073_p0 = pnand %p2072_p5, %p2066_p1 }
  0x91   : > { %2076 = shalt.err (!%p2073_p0)
}
  0x92   : > { %p2821_p4 = scmp.ne.s32.totalorder %s2805_s24, 0  ;;  %s2251_s9 = smov [#allocation13]  }
  0x93   : > { %s343_s11 = sshll.u32 %s2251_s9, 4  ;;  %s1521_s6 = sshll.u32 %s2448_s22, 3  ;;  %s344_s11 = int_to_ptr.vmem [resolvable:$true] %s343_s11 }
  0x94   : > { %1837 = dma.hbm_to_vmem [thread:$0]  (!%p2821_p4), %s2761_s5, 1024, %s318_s30, [#allocation9], %s2818_s25, %s2818_s25, %s2817_s20  }
  0x95   : > { %s2077_s27 = scalar_lea.hbm %s2763_s7, 1024 }
  0x96   : > { %p2078_p0 = scmp.ne.s32.totalorder %s2763_s7, %s2077_s27  ;;  %p2084_p7 = scmp.lt.u32.totalorder %s2077_s27, %s2763_s7 }
  0x98   : > { %p2080_p11 = pnand %p2078_p0, %p2820_p8 }
  0x9a   : > { %p2081_p13 = pneg %p2080_p11 }
  0x9c   : > { %p2086_p10 = pnand %p2084_p7, %p2081_p13 }
  0x9e   : > { %2089 = shalt.err (!%p2086_p10)
}
  0x9f   : > { %s2090_s30 = scalar_lea.vmem %s344_s11, 1024  ;;  %p2098_p6 = scmp.lt.s32.totalorder %s344_s11, %s344_s11 }
  0xa0   : > { %p2091_p9 = scmp.ne.s32.totalorder %s344_s11, %s2090_s30  ;;  %p2099_p3 = scmp.lt.s32.totalorder %s2090_s30, %s2090_s30 }
  0xa2   : > { %p2093_p12 = pnand %p2091_p9, %p2820_p8  ;;  %p2100_p5 = por %p2099_p3, %p2098_p6 }
  0xa4   : > { %p2094_p1 = pneg %p2093_p12 }
  0xa6   : > { %p2101_p2 = pnand %p2100_p5, %p2094_p1 }
  0xa8   : > { %2104 = shalt.err (!%p2101_p2)
}
  0xa9   : > { %1843 = dma.hbm_to_vmem [thread:$0]  (!%p2821_p4), %s2763_s7, 1024, %s344_s11, [#allocation12], %s2818_s25, %s2818_s25, %s2817_s20  }
  0xaa   : > { %s1522_s12 = sshll.u32 %s2243_s16, 7  ;;  %s367_s24 = scalar_lea.vmem [#allocation2], %s1521_s6 }
  0xab   : > { %s2555_s29 = scalar_lea.hbm %s2756_s0, %s1522_s12  ;;  %s374_s27 = sshll.u32 %s367_s24, 4  ;;  %s375_s27 = int_to_ptr.vmem [resolvable:$true] %s374_s27 }
  0xac   : > { %s364_s28 = scalar_lea.sflag [#allocation3], %s2448_s22  ;;  %s2105_s4 = scalar_lea.hbm %s2555_s29, 128 }
  0xad   : > { %p2106_p2 = scmp.ne.s32.totalorder %s2555_s29, %s2105_s4  ;;  %p2822_p8 = scmp.ne.s32.totalorder %s2816_s13, 0 }
  0xae   : > { %s2110_s30 = scalar_lea.hbm %s2756_s0, 256  ;;  %p2111_p4 = scmp.lt.u32.totalorder %s2555_s29, %s2756_s0 }
  0xaf   : > { %p2108_p0 = pnand %p2106_p2, %p2822_p8  ;;  %p2112_p13 = scmp.lt.u32.totalorder %s2110_s30, %s2105_s4 }
  0xb0   : > { %p2114_p10 = scmp.lt.u32.totalorder %s2105_s4, %s2555_s29 }
  0xb1   : > { %p2109_p11 = pneg %p2108_p0  ;;  %p2113_p7 = por %p2112_p13, %p2111_p4 }
  0xb3   : > { %p2115_p9 = por %p2114_p10, %p2113_p7 }
  0xb5   : > { %p2116_p12 = pnand %p2115_p9, %p2109_p11 }
  0xb7   : > { %2119 = shalt.err (!%p2116_p12)
}
  0xb8   : > { %s2120_s22 = scalar_lea.vmem %s375_s27, 128  ;;  %s2252_s6 = smov [#allocation2]  }
  0xb9   : > { %p2121_p1 = scmp.ne.s32.totalorder %s375_s27, %s2120_s22  ;;  %s2125_s12 = sshll.u32 %s2252_s6, 4  ;;  %s2126_s12 = int_to_ptr.vmem [resolvable:$false] %s2125_s12 }
  0xba   : > { %s2127_s9 = scalar_lea.vmem %s2126_s12, 256  ;;  %p2128_p5 = scmp.lt.s32.totalorder %s375_s27, %s2126_s12 }
  0xbb   : > { %p2123_p6 = pnand %p2121_p1, %p2822_p8  ;;  %p2129_p2 = scmp.lt.s32.totalorder %s2127_s9, %s2120_s22 }
  0xbd   : > { %p2124_p3 = pneg %p2123_p6  ;;  %p2130_p0 = por %p2129_p2, %p2128_p5 }
  0xbf   : > { %p2131_p4 = pnand %p2130_p0, %p2124_p3 }
  0xc1   : > { %2134 = shalt.err (!%p2131_p4)
}
  0xc2   : > { %p2823_p13 = scmp.ne.s32.totalorder %s2814_s23, 0  ;;  %s2135_s26 = scalar_lea.hbm %s2469_s18, 1024 }
  0xc3   : > { %p2136_p11 = scmp.ne.s32.totalorder %s2469_s18, %s2135_s26  ;;  %s2140_s11 = scalar_lea.hbm %s2758_s2, 2048 }
  0xc4   : > { %1847 = dma.hbm_to_vmem [thread:$0]  (!%p2823_p13), %s2555_s29, 128, %s375_s27, %s364_s28  }
  0xc5   : > { %p2138_p7 = pnand %p2136_p11, %p2822_p8  ;;  %p2141_p9 = scmp.lt.u32.totalorder %s2469_s18, %s2758_s2 }
  0xc6   : > { %p2142_p12 = scmp.lt.u32.totalorder %s2140_s11, %s2135_s26  ;;  %p2144_p6 = scmp.lt.u32.totalorder %s2135_s26, %s2469_s18 }
  0xc7   : > { %p2139_p10 = pneg %p2138_p7 }
  0xc8   : > { %p2143_p1 = por %p2142_p12, %p2141_p9 }
  0xca   : > { %p2145_p3 = por %p2144_p6, %p2143_p1 }
  0xcc   : > { %p2146_p5 = pnand %p2145_p3, %p2139_p10 }
  0xce   : > { %2149 = shalt.err (!%p2146_p5)
}
  0xcf   : > { %s2150_s29 = scalar_lea.vmem %s2506_s10, 1024  ;;  %s2253_s27 = smov [#allocation7]  }
  0xd0   : > { %p2151_p2 = scmp.ne.s32.totalorder %s2506_s10, %s2150_s29  ;;  %s2155_s28 = sshll.u32 %s2253_s27, 4  ;;  %s2156_s28 = int_to_ptr.vmem [resolvable:$false] %s2155_s28 }
  0xd1   : > { %s2157_s3 = scalar_lea.vmem %s2156_s28, 2048  ;;  %p2158_p11 = scmp.lt.s32.totalorder %s2506_s10, %s2156_s28 }
  0xd2   : > { %p2153_p0 = pnand %p2151_p2, %p2822_p8  ;;  %p2159_p7 = scmp.lt.s32.totalorder %s2157_s3, %s2150_s29 }
  0xd4   : > { %p2154_p4 = pneg %p2153_p0  ;;  %p2160_p9 = por %p2159_p7, %p2158_p11 }
  0xd6   : > { %p2161_p12 = pnand %p2160_p9, %p2154_p4 }
  0xd8   : > { %2164 = shalt.err (!%p2161_p12)
}
  0xd9   : > { %1853 = dma.hbm_to_vmem [thread:$0]  (!%p2823_p13), %s2469_s18, 1024, %s2506_s10, %s2471_s15, %s2818_s25, %s2818_s25, %s2817_s20  }
  0xda   : > { %p2824_p8 = scmp.ne.s32.totalorder %s2804_s21, 0 }
  0xdb   : > { %s2603_s13 = sand.u32 (!%p2824_p8), 1, %s2235_s14   ;;  %p2825_p10 = scmp.ne.s32.totalorder (!%p2824_p8), %s2801_s19, 0 }
  0xdc   : > { %432 = sbr.rel (%p2824_p8) target bundleno = 1833 (0x729), region = 60  ;;  %s1530_s8 = sshll.u32 (!%p2824_p8), %s2603_s13, 3 }
  0xdd   : > { %s435_s22 = scalar_lea.sflag (!%p2824_p8), [#allocation3], %s2603_s13  ;;  %s2609_s23 = scalar_lea.vmem (!%p2824_p8), [#allocation2], %s1530_s8 }
  0xe3   : > { %2210 = dma.done.wait (%p2825_p10), %s435_s22, 128  }
  0xe4   : > { %2212 = vsyncadd (%p2825_p10), %s435_s22, 4294967168  ;;  %s443_s15 = sand.u32 1, %s2334_s17   ;;  %s1531_s21 = sshll.u32 %s2603_s13, 6 }
  0xe5   : > { %s444_s18 = scalar_lea.sflag [#allocation6], %s443_s15  ;;  %s2617_s20 = scalar_lea.vmem [#allocation5], %s1531_s21 }
  0xe6   : > { %2214 = dma.done.wait (%p2825_p10), %s444_s18, 2048  }
  0xe7   : > { %2216 = vsyncadd (%p2825_p10), %s444_s18, 4294965248  ;;  %s2623_s25 = scalar_lea.vmem [#allocation7], %s1531_s21  ;;  %p2826_p13 = scmp.eq.s32.totalorder %s2334_s17, 0 }
  0xe9   : > { %2218 = dma.done.wait (%p2826_p13), [#allocation9], 2048   ;;  %p2827_p1 = pmov %p2826_p13 }
  0xeb   : > { %2220 = vsyncadd (%p2827_p1), [#allocation9], 4294965248  ;;  %p2828_p6 = pmov %p2827_p1 }
  0xec   : > { %p2829_p3 = pmov %p2827_p1 }
  0xed   : > { %2222 = dma.done.wait (%p2828_p6), [#allocation12], 2048  }
  0xee   : > { %2224 = vsyncadd (%p2829_p3), [#allocation12], 4294965248  ;;  %v2254_v0 = vmov 0.0   ;;  %vm2255_vm0 = vmmov 0   ;;  %v1909_v1 = vld [vmem:[#allocation10] sm:$0xff]   ;;  %v1910_v2 = vld [vmem:[#allocation10 + $0x8] sm:$0xff]  }
  0xef   : > { %1663 = vmatprep.subr.bf16.mxu0 %v2254_v0  ;;  %1679 = vmatprep.mubr.msk.bf16.mxu0 %vm2255_vm0, %v2254_v0  ;;  %v1911_v3 = vld [vmem:[#allocation10 + $0x10] sm:$0xff]   ;;  %v1912_v4 = vld [vmem:[#allocation10 + $0x18] sm:$0xff]   ;;  %v1917_v5 = vld [vmem:[%s2617_s20] sm:$0xff]   ;;  %p523_p5 = scmp.lt.s32.totalorder %s2334_s17, 1  ;;  %s2830_s9 = sld [smem:[#allocation27_spill]] }
  0xf0   : > { %1683 = vmatprep.subr.bf16.mxu1 %v1909_v1  ;;  %1699 = vmatprep.mubr.bf16.mxu1 %v1917_v5  ;;  %v1913_v6 = vld [vmem:[#allocation10 + $0x20] sm:$0xff]   ;;  %v1914_v8 = vld [vmem:[#allocation10 + $0x28] sm:$0xff]   ;;  %v1915_v10 = vld [vmem:[#allocation10 + $0x30] sm:$0xff]   ;;  %s2831_s24 = sld [smem:[#allocation24_spill]]  ;;  %s2833_s27 = sld [smem:[#allocation31_spill]] }
  0xf1   : > { %1684 = vmatpush3.bf16.msra.mxu1 %v1909_v1  ;;  %v1923_v7 = vld [vmem:[#allocation8] sm:$0xff]   ;;  %v1924_v9 = vld [vmem:[#allocation8 + $0x8] sm:$0xff]   ;;  %v1925_v11 = vld [vmem:[#allocation8 + $0x10] sm:$0xff]   ;;  %s524_s19 = scalar_select %p523_p5, %s2334_s17, 1 }
  0xf2   : > { %1685 = vmatprep.subr.bf16.mxu1 %v1910_v2  ;;  %1664 = vmatpush3.bf16.msra.mxu0 %v1923_v7  ;;  %v1916_v12 = vld [vmem:[#allocation10 + $0x38] sm:$0xff]   ;;  %v1929_v14 = vld [vmem:[#allocation8 + $0x20] sm:$0xff]   ;;  %v1918_v15 = vld [vmem:[%s2617_s20 + $0x8] sm:$0xff]   ;;  %s2832_s1 = sld [smem:[#allocation30_spill]]  ;;  %s1590_s28 = sshll.u32 %s2334_s17, 7 }
  0xf3   : > { %1665 = vmatprep.subr.bf16.mxu0 %v2254_v0  ;;  %v1926_v13 = vld [vmem:[#allocation8 + $0x18] sm:$0xff]   ;;  %v1919_v16 = vld [vmem:[%s2617_s20 + $0x10] sm:$0xff]   ;;  %v1930_v17 = vld [vmem:[#allocation8 + $0x28] sm:$0xff]   ;;  %s1538_s10 = sshll.u32 %s524_s19, 1  ;;  %s522_s3 = scalar_lea.vmem [#allocation14], %s1530_s8 }
  0xf4   : > { %v1931_v18 = vld [vmem:[#allocation8 + $0x30] sm:$0xff]   ;;  %v1920_v19 = vld [vmem:[%s2617_s20 + $0x18] sm:$0xff]   ;;  %v1921_v20 = vld [vmem:[%s2617_s20 + $0x20] sm:$0xff]   ;;  %s1351_s22 = sshll.u32 %s522_s3, 4  ;;  %s2834_s21 = sld [smem:[#allocation32_spill]]  ;;  %s2714_s22 = int_to_ptr.vmem [resolvable:$true] %s1351_s22 }
  0xf5   : > { %1686 = vmatpush3.bf16.msra.mxu1 %v1910_v2  ;;  %v1932_v21 = vld [vmem:[#allocation8 + $0x38] sm:$0xff]   ;;  %v1922_v24 = vld [vmem:[%s2617_s20 + $0x28] sm:$0xff]   ;;  %v1927_v25 = vld [vmem:[%s2617_s20 + $0x30] sm:$0xff]   ;;  %s526_s26 = scalar_lea.vmem %s2830_s9, %s1538_s10  ;;  %s2257_s17 = smov [#allocation14]  }
  0xf6   : > { %1687 = vmatprep.subr.bf16.mxu1 %v1911_v3  ;;  %1666 = vmatpush3.bf16.msra.mxu0 %v1924_v9  ;;  %v2649_v22 = vld [vmem:[%s2609_s23] sm:$0xff]  ;;  %v1933_v57 = vld [vmem:[#allocation11] sm:$0xff]   ;;  %v1934_v58 = vld [vmem:[#allocation11 + $0x8] sm:$0xff]   ;;  %p2835_p0 = scmp.ne.s32.totalorder %s2831_s24, 0  ;;  %s2169_s8 = sshll.u32 %s2257_s17, 4  ;;  %s2170_s8 = int_to_ptr.vmem [resolvable:$false] %s2169_s8 }
  0xf7   : > { %1667 = vmatprep.subr.bf16.mxu0 %v2254_v0  ;;  %v531_v23 = vpack.c.bf16 %v2649_v22, %v2649_v22  ;;  %v1928_v26 = vld [vmem:[%s2617_s20 + $0x38] sm:$0xff]   ;;  %v1941_v59 = vld [vmem:[%s2623_s25] sm:$0xff]   ;;  %v1935_v60 = vld [vmem:[#allocation11 + $0x10] sm:$0xff]   ;;  %s1338_s20 = scalar_lea.sflag [#allocation4], %s2603_s13  ;;  %s2171_s19 = scalar_lea.vmem %s2170_s8, 256 }
  0xf8   : > { %v1936_v61 = vld [vmem:[#allocation11 + $0x18] sm:$0xff]   ;;  %v1937_v62 = vld [vmem:[#allocation11 + $0x20] sm:$0xff]   ;;  %v1938_v63 = vld [vmem:[#allocation11 + $0x28] sm:$0xff]   ;;  %p2172_p7 = scmp.lt.s32.totalorder %s2714_s22, %s2170_s8 }
  0xf9   : > { %1688 = vmatpush3.bf16.msra.mxu1 %v1911_v3  ;;  %v1939_v1 = vld [vmem:[#allocation11 + $0x30] sm:$0xff]   ;;  %v1940_v2 = vld [vmem:[#allocation11 + $0x38] sm:$0xff]   ;;  %v1942_v3 = vld [vmem:[%s2623_s25 + $0x8] sm:$0xff]  }
  0xfa   : > { %1689 = vmatprep.subr.bf16.mxu1 %v1912_v4  ;;  %1668 = vmatpush3.bf16.msra.mxu0 %v1925_v11  ;;  %v1944_v5 = vld [vmem:[%s2623_s25 + $0x18] sm:$0xff]   ;;  %v1946_v7 = vld [vmem:[%s2623_s25 + $0x28] sm:$0xff]   ;;  %v2256_v11 = vmov 0   ;;  %s2712_s18 = scalar_lea.hbm %s2834_s21, %s1590_s28 }
  0xfb   : > { %1669 = vmatprep.subr.bf16.mxu0 %v2254_v0  ;;  %v1948_v9 = vld [vmem:[%s2623_s25 + $0x38] sm:$0xff]  }
  0xfd   : > { %1690 = vmatpush3.bf16.msra.mxu1 %v1912_v4  ;;  %v1943_v4 = vld [vmem:[%s2623_s25 + $0x10] sm:$0xff]  }
  0xfe   : > { %1691 = vmatprep.subr.bf16.mxu1 %v1913_v6  ;;  %1670 = vmatpush3.bf16.msra.mxu0 %v1926_v13 }
  0xff   : > { %1671 = vmatprep.subr.bf16.mxu0 %v2254_v0 }
 0x101   : > { %1692 = vmatpush3.bf16.msra.mxu1 %v1913_v6  ;;  %v1945_v6 = vld [vmem:[%s2623_s25 + $0x20] sm:$0xff]  }
 0x102   : > { %1693 = vmatprep.subr.bf16.mxu1 %v1914_v8  ;;  %1672 = vmatpush3.bf16.msra.mxu0 %v1929_v14 }
 0x103   : > { %1673 = vmatprep.subr.bf16.mxu0 %v2254_v0 }
 0x105   : > { %1694 = vmatpush3.bf16.msra.mxu1 %v1914_v8  ;;  %v1947_v8 = vld [vmem:[%s2623_s25 + $0x30] sm:$0xff]   ;;  %s2165_s25 = scalar_lea.vmem %s2714_s22, 128 }
 0x106   : > { %1695 = vmatprep.subr.bf16.mxu1 %v1915_v10  ;;  %1674 = vmatpush3.bf16.msra.mxu0 %v1930_v17  ;;  %p2166_p2 = scmp.ne.s32.totalorder %s2714_s22, %s2165_s25  ;;  %p2173_p9 = scmp.lt.s32.totalorder %s2171_s19, %s2165_s25 }
 0x107   : > { %1675 = vmatprep.subr.bf16.mxu0 %v2254_v0 }
 0x108   : > { %p2167_p4 = pnand %p2166_p2, %p2835_p0  ;;  %p2174_p12 = por %p2173_p9, %p2172_p7 }
 0x109   : > { %1696 = vmatpush3.bf16.msra.mxu1 %v1915_v10  ;;  %v1136_v10 = vld [vmem:[%s526_s26] sm:$0x3] }
 0x10a   : > { %1697 = vmatprep.subr.bf16.mxu1 %v1916_v12  ;;  %1676 = vmatpush3.bf16.msra.mxu0 %v1931_v18  ;;  %vm1137_vm1 = vnez %v1136_v10  ;;  %p2168_p11 = pneg %p2167_p4 }
 0x10b   : > { %1677 = vmatprep.subr.bf16.mxu0 %v2254_v0 }
 0x10c   : > { %p2175_p8 = pnand %p2174_p12, %p2168_p11 }
 0x10d   : > { %1698 = vmatpush3.bf16.msra.mxu1 %v1916_v12  ;;  %v1138_v12 = vsel %vm1137_vm1, 16843009, %v2256_v11 }
 0x10e   : > { %1747 = vmatprep.subr.bf16.mxu1 %v2254_v0  ;;  %1678 = vmatpush3.bf16.msra.mxu0 %v1932_v21  ;;  %v1139_v13 = vunpack.c.0.s8 %v1138_v12 }
 0x10f   : > { %1715 = vmatprep.subr.bf16.mxu0 %v1933_v57 }
 0x110   : > { %1700 = vmatmul.mubr.bf16.vlgmr.msra.gmra.mrb[0].mxu1 %v1918_v15  ;;  %vm1140_vm2 = vcmp.ne.s32.totalorder %v1139_v13, 0 }
 0x111   : > { %1703 = vmatprep.mubr.bf16.mxu1 %v1919_v16  ;;  %1680 = vmatmul.mubr.bf16.vlgmr.msra.gmra.mrb[0].mxu0 %v531_v23 }
 0x112   : > { %1716 = vmatpush3.bf16.msra.mxu0 %v1933_v57  ;;  %1731 = vmatprep.mubr.bf16.mxu0 %v1941_v59  ;;  %v1954_v57 = vld [vmem:[#allocation13 + $0x28] sm:$0xff]   ;;  %v1956_v59 = vld [vmem:[#allocation13 + $0x38] sm:$0xff]  }
 0x113   : > { %1717 = vmatprep.subr.bf16.mxu0 %v1934_v58 }
 0x116   : > { %1718 = vmatpush3.bf16.msra.mxu0 %v1934_v58  ;;  %v1955_v58 = vld [vmem:[#allocation13 + $0x30] sm:$0xff]  }
 0x117   : > { %1719 = vmatprep.subr.bf16.mxu0 %v1935_v60 }
 0x118   : > { %1704 = vmatmul.mubr.bf16.gmra.mrb[4].mxu1 %v1920_v19 }
 0x119   : > { %1707 = vmatprep.mubr.bf16.mxu1 %v1921_v20 }
 0x11a   : > { %1720 = vmatpush3.bf16.msra.mxu0 %v1935_v60 }
 0x11b   : > { %1721 = vmatprep.subr.bf16.mxu0 %v1936_v61 }
 0x11e   : > { %1722 = vmatpush3.bf16.msra.mxu0 %v1936_v61 }
 0x11f   : > { %1723 = vmatprep.subr.bf16.mxu0 %v1937_v62 }
 0x120   : > { %1708 = vmatmul.mubr.bf16.gmra.mrb[8].mxu1 %v1922_v24 }
 0x121   : > { %1711 = vmatprep.mubr.bf16.mxu1 %v1927_v25 }
 0x122   : > { %1724 = vmatpush3.bf16.msra.mxu0 %v1937_v62 }
 0x123   : > { %1725 = vmatprep.subr.bf16.mxu0 %v1938_v63 }
 0x126   : > { %1726 = vmatpush3.bf16.msra.mxu0 %v1938_v63 }
 0x127   : > { %1727 = vmatprep.subr.bf16.mxu0 %v1939_v1 }
 0x128   : > { %1712 = vmatmul.mubr.bf16.gmra.mrb[12].mxu1 %v1928_v26 }
 0x129   : > { %1763 = vmatprep.mubr.msk.bf16.mxu1 %vm2255_vm0, %v2254_v0 }
 0x12a   : > { %1728 = vmatpush3.bf16.msra.mxu0 %v1939_v1 }
 0x12b   : > { %1729 = vmatprep.subr.bf16.mxu0 %v1940_v2 }
 0x12e   : > { %1730 = vmatpush3.bf16.msra.mxu0 %v1940_v2 }
 0x12f   : > { %1767 = vmatprep.subr.bf16.mxu0 %v2254_v0 }
 0x131   : > { %1732 = vmatmul.mubr.bf16.vlgmr.msra.gmra.mrb[4].mxu0 %v1942_v3 }
 0x132   : > { %1735 = vmatprep.mubr.bf16.mxu0 %v1943_v4 }
 0x139   : > { %1736 = vmatmul.mubr.bf16.gmra.mrb[8].mxu0 %v1944_v5 }
 0x13a   : > { %1739 = vmatprep.mubr.bf16.mxu0 %v1945_v6 }
 0x141   : > { %1740 = vmatmul.mubr.bf16.gmra.mrb[12].mxu0 %v1946_v7  ;;  %v1308_v7 = vlaneseq }
 0x142   : > { %1743 = vmatprep.mubr.bf16.mxu0 %v1947_v8 }
 0x143   : > { %v1309_v8 = vand.u32 127, %v1308_v7 }
 0x145   : > { %vm1310_vm3 = vcmp.lt.s32.totalorder %v1309_v8, 32 }
 0x149   : > { %1744 = vmatmul.mubr.bf16.gmra.mrb[16].mxu0 %v1948_v9 }
 0x14a   : > { %1783 = vmatprep.mubr.msk.bf16.mxu0 %vm2255_vm0, %v2254_v0 }
 0x1e3   : > { %v1701_v27 = vpop.f32.mrb[0].mxu1 }
 0x1e4   : > { %v798_v28 = vpop.f32.mrb[1].mxu1  ;;  %v630_v39 = vpop.f32.mrb[0].mxu0 }
 0x1e5   : > { %v1702_v29 = vpop.f32.mrb[2].mxu1  ;;  %v1681_v40 = vpop.f32.mrb[1].mxu0  ;;  %v1086_v55 = vmul.f32 0.35355338, %v630_v39 }
 0x1e6   : > { %v1089_v30 = vpack.c.bf16 %v1702_v29, %v1701_v27  ;;  %v801_v31 = vpop.f32.mrb[3].mxu1  ;;  %v633_v41 = vpop.f32.mrb[2].mxu0 }
 0x1e7   : > { %v1088_v32 = vpack.c.bf16 %v801_v31, %v798_v28  ;;  %v1682_v43 = vpop.f32.mrb[3].mxu0  ;;  %v1087_v56 = vpack.c.bf16 %v1086_v55, %v1086_v55  ;;  %v1952_v55 = vld [vmem:[#allocation13 + $0x18] sm:$0xff]  }
 0x1e9   : > { %1748 = vmatpush3.bf16.xpose.msra.mxu1 %v1088_v32 }
 0x1ea   : > { %1749 = vmatprep.subr.bf16.mxu1 %v2254_v0 }
 0x1eb   : > { %v1705_v33 = vpop.f32.mrb[4].mxu1 }
 0x1ec   : > { %v814_v34 = vpop.f32.mrb[5].mxu1 }
 0x1ed   : > { %v1706_v35 = vpop.f32.mrb[6].mxu1 }
 0x1ee   : > { %v1091_v36 = vpack.c.bf16 %v1706_v35, %v1705_v33  ;;  %v817_v37 = vpop.f32.mrb[7].mxu1 }
 0x1ef   : > { %v1090_v38 = vpack.c.bf16 %v817_v37, %v814_v34 }
 0x1f1   : > { %1750 = vmatpush3.bf16.xpose.msra.mxu1 %v1089_v30 }
 0x1f2   : > { %1751 = vmatprep.subr.bf16.mxu1 %v2254_v0 }
 0x1f3   : > { %v1709_v42 = vpop.f32.mrb[8].mxu1 }
 0x1f4   : > { %v830_v44 = vpop.f32.mrb[9].mxu1 }
 0x1f5   : > { %v1710_v45 = vpop.f32.mrb[10].mxu1 }
 0x1f6   : > { %v1093_v46 = vpack.c.bf16 %v1710_v45, %v1709_v42  ;;  %v833_v47 = vpop.f32.mrb[11].mxu1 }
 0x1f7   : > { %v1092_v48 = vpack.c.bf16 %v833_v47, %v830_v44 }
 0x1f9   : > { %1752 = vmatpush3.bf16.xpose.msra.mxu1 %v1090_v38 }
 0x1fa   : > { %1753 = vmatprep.subr.bf16.mxu1 %v2254_v0 }
 0x1fb   : > { %v1713_v49 = vpop.f32.mrb[12].mxu1 }
 0x1fc   : > { %v846_v50 = vpop.f32.mrb[13].mxu1 }
 0x1fd   : > { %v1714_v51 = vpop.f32.mrb[14].mxu1 }
 0x1fe   : > { %v1095_v52 = vpack.c.bf16 %v1714_v51, %v1713_v49  ;;  %v849_v53 = vpop.f32.mrb[15].mxu1  ;;  %v1949_v51 = vld [vmem:[#allocation13] sm:$0xff]  }
 0x1ff   : > { %v1094_v54 = vpack.c.bf16 %v849_v53, %v846_v50  ;;  %v1950_v53 = vld [vmem:[#allocation13 + $0x8] sm:$0xff]  }
 0x201   : > { %1754 = vmatpush3.bf16.xpose.msra.mxu1 %v1091_v36 }
 0x202   : > { %1755 = vmatprep.subr.bf16.mxu1 %v2254_v0 }
 0x204   : > { %v1733_v19 = vpop.f32.mrb[4].mxu0 }
 0x205   : > { %v1023_v20 = vpop.f32.mrb[5].mxu0 }
 0x206   : > { %v1734_v21 = vpop.f32.mrb[6].mxu0 }
 0x207   : > { %v1153_v23 = vpack.c.bf16 %v1734_v21, %v1733_v19  ;;  %v1026_v24 = vpop.f32.mrb[7].mxu0 }
 0x208   : > { %v1152_v25 = vpack.c.bf16 %v1026_v24, %v1023_v20 }
 0x209   : > { %1756 = vmatpush3.bf16.xpose.msra.mxu1 %v1092_v48 }
 0x20a   : > { %1757 = vmatprep.subr.bf16.mxu1 %v2254_v0  ;;  %1768 = vmatpush3.bf16.msra.mxu0 %v1152_v25 }
 0x20b   : > { %1769 = vmatprep.subr.bf16.mxu0 %v2254_v0 }
 0x20c   : > { %v1737_v26 = vpop.f32.mrb[8].mxu0 }
 0x20d   : > { %v1039_v27 = vpop.f32.mrb[9].mxu0 }
 0x20e   : > { %v1738_v28 = vpop.f32.mrb[10].mxu0  ;;  %1770 = vmatpush3.bf16.msra.mxu0 %v1153_v23 }
 0x20f   : > { %v1155_v29 = vpack.c.bf16 %v1738_v28, %v1737_v26  ;;  %v1042_v30 = vpop.f32.mrb[11].mxu0  ;;  %1771 = vmatprep.subr.bf16.mxu0 %v2254_v0 }
 0x210   : > { %v1154_v31 = vpack.c.bf16 %v1042_v30, %v1039_v27 }
 0x211   : > { %1758 = vmatpush3.bf16.xpose.msra.mxu1 %v1093_v46 }
 0x212   : > { %1759 = vmatprep.subr.bf16.mxu1 %v2254_v0  ;;  %1772 = vmatpush3.bf16.msra.mxu0 %v1154_v31 }
 0x213   : > { %1773 = vmatprep.subr.bf16.mxu0 %v2254_v0 }
 0x214   : > { %v1741_v32 = vpop.f32.mrb[12].mxu0 }
 0x215   : > { %v1055_v33 = vpop.f32.mrb[13].mxu0 }
 0x216   : > { %v1742_v34 = vpop.f32.mrb[14].mxu0  ;;  %1774 = vmatpush3.bf16.msra.mxu0 %v1155_v29 }
 0x217   : > { %v1157_v35 = vpack.c.bf16 %v1742_v34, %v1741_v32  ;;  %v1058_v36 = vpop.f32.mrb[15].mxu0  ;;  %1775 = vmatprep.subr.bf16.mxu0 %v2254_v0 }
 0x218   : > { %v1156_v37 = vpack.c.bf16 %v1058_v36, %v1055_v33 }
 0x219   : > { %1760 = vmatpush3.bf16.xpose.msra.mxu1 %v1094_v54  ;;  %v1951_v54 = vld [vmem:[#allocation13 + $0x10] sm:$0xff]  }
 0x21a   : > { %1761 = vmatprep.subr.bf16.mxu1 %v2254_v0  ;;  %1776 = vmatpush3.bf16.msra.mxu0 %v1156_v37 }
 0x21b   : > { %1777 = vmatprep.subr.bf16.mxu0 %v2254_v0 }
 0x21c   : > { %v1745_v40 = vpop.f32.mrb[16].mxu0 }
 0x21d   : > { %v1071_v41 = vpop.f32.mrb[17].mxu0 }
 0x21e   : > { %v1746_v43 = vpop.f32.mrb[18].mxu0  ;;  %1778 = vmatpush3.bf16.msra.mxu0 %v1157_v35 }
 0x21f   : > { %v1159_v44 = vpack.c.bf16 %v1746_v43, %v1745_v40  ;;  %v1074_v45 = vpop.f32.mrb[19].mxu0  ;;  %1779 = vmatprep.subr.bf16.mxu0 %v2254_v0 }
 0x220   : > { %v1158_v46 = vpack.c.bf16 %v1074_v45, %v1071_v41 }
 0x221   : > { %1762 = vmatpush3.bf16.xpose.msra.mxu1 %v1095_v52 }
 0x222   : > { %1780 = vmatpush3.bf16.msra.mxu0 %v1158_v46 }
 0x223   : > { %1781 = vmatprep.subr.bf16.mxu0 %v2254_v0 }
 0x226   : > { %1782 = vmatpush3.bf16.msra.mxu0 %v1159_v44 }
 0x227   : > { %1787 = vmatprep.subr.bf16.mxu0 %v2254_v0 }
 0x228   : > { %1764 = vmatmul.mubr.bf16.vlgmr.msra.gmra.mrb[16].mxu1 %v1087_v56  ;;  %v1953_v56 = vld [vmem:[#allocation13 + $0x20] sm:$0xff]  }
 0x2fb   : > { %v1130_v14 = vpop.f32.mrb[16].mxu1 }
 0x2fc   : > { %v1765_v15 = vpop.f32.mrb[17].mxu1  ;;  %v1141_v16 = vsel %vm1140_vm2, -1e+09, %v1130_v14 }
 0x2fd   : > { %1142 = vmax.xlane.f32.xlu0 %v1141_v16  ;;  %v1133_v17 = vpop.f32.mrb[18].mxu1 }
 0x2fe   : > { %v1766_v18 = vpop.f32.mrb[19].mxu1 }
 0x2ff   : > { %v1588_v18 = vld [vmem:[%s2833_s27] ss:$0 sm:$0xff] }
 0x38a   : > { %v1143_v38 = vpop.xlane.xlu0 %1142 }
 0x38b   : > { %v1144_v39 = vsub.f32 %v1141_v16, %v1143_v38  ;;  %v1587_v16 = vld [vmem:[%s2832_s1] ss:$0 sm:$0xff] }
 0x38d   : > { %v1145_v42 = vmul.f32 1.442695, %v1144_v39 }
 0x38f   : > { %1957 = vpow2.f32 %v1145_v42 }
 0x399   : > { %v1958_v47 = vpop.eup %1957 }
 0x39a   : > { %1147 = vadd.xlane.f32.xlu0 %v1958_v47 }
 0x427   : > { %v1148_v48 = vpop.xlane.xlu0 %1147 }
 0x428   : > { %1959 = vrcp.f32 %v1148_v48 }
 0x432   : > { %v1960_v49 = vpop.eup %1959 }
 0x433   : > { %v1150_v50 = vmul.f32 %v1960_v49, %v1958_v47 }
 0x435   : > { %v1151_v52 = vpack.c.bf16 %v1150_v50, %v1150_v50 }
 0x437   : > { %1784 = vmatmul.mubr.bf16.vlgmr.msra.gmra.mrb[20].mxu0 %v1151_v52 }
 0x438   : > { %1788 = vmatpush3.bf16.msra.mxu0 %v1949_v51  ;;  %1803 = vmatprep.mubr.msk.bf16.mxu0 %vm2255_vm0, %v2254_v0 }
 0x439   : > { %1789 = vmatprep.subr.bf16.mxu0 %v2254_v0 }
 0x43c   : > { %1790 = vmatpush3.bf16.msra.mxu0 %v1950_v53 }
 0x43d   : > { %1791 = vmatprep.subr.bf16.mxu0 %v2254_v0 }
 0x440   : > { %1792 = vmatpush3.bf16.msra.mxu0 %v1951_v54 }
 0x441   : > { %1793 = vmatprep.subr.bf16.mxu0 %v2254_v0 }
 0x444   : > { %1794 = vmatpush3.bf16.msra.mxu0 %v1952_v55 }
 0x445   : > { %1795 = vmatprep.subr.bf16.mxu0 %v2254_v0 }
 0x448   : > { %1796 = vmatpush3.bf16.msra.mxu0 %v1953_v56 }
 0x449   : > { %1797 = vmatprep.subr.bf16.mxu0 %v2254_v0 }
 0x44c   : > { %1798 = vmatpush3.bf16.msra.mxu0 %v1954_v57 }
 0x44d   : > { %1799 = vmatprep.subr.bf16.mxu0 %v2254_v0 }
 0x450   : > { %1800 = vmatpush3.bf16.msra.mxu0 %v1955_v58 }
 0x451   : > { %1801 = vmatprep.subr.bf16.mxu0 %v2254_v0 }
 0x454   : > { %1802 = vmatpush3.bf16.msra.mxu0 %v1956_v59 }
 0x50a   : > { %v1194_v60 = vpop.f32.mrb[20].mxu0 }
 0x50b   : > { %v1200_v61 = vpack.c.bf16 %v1194_v60, %v1194_v60  ;;  %v1785_v62 = vpop.f32.mrb[21].mxu0 }
 0x50c   : > { %v1197_v63 = vpop.f32.mrb[22].mxu0 }
 0x50d   : > { %v1786_v1 = vpop.f32.mrb[23].mxu0  ;;  %1804 = vmatmul.mubr.bf16.vlgmr.msra.gmra.mrb[24].mxu0 %v1200_v61 }
 0x5e0   : > { %v1299_v2 = vpop.f32.mrb[24].mxu0 }
 0x5e1   : > { %v1300_v3 = vadd.f32 %v1299_v2, %v2649_v22  ;;  %v1805_v4 = vpop.f32.mrb[25].mxu0 }
 0x5e2   : > { %v1302_v5 = vpop.f32.mrb[26].mxu0 }
 0x5e3   : > { %1305 = vadd.xlane.f32.xlu1 %v1300_v3  ;;  %v1806_v6 = vpop.f32.mrb[27].mxu0 }
 0x670   : > { %v1306_v9 = vpop.xlane.xlu1 %1305 }
 0x671   : > { %v1307_v0 = vmul.f32 0.03125, %v1306_v9 }
 0x673   : > { %v1311_v10 = vsub.f32 %v1300_v3, %v1307_v0 }
 0x675   : > { %v1312_v11 = vsel %vm1310_vm3, %v1311_v10, 0.0 }
 0x676   : > { %v1313_v12 = vmul.f32 %v1312_v11, %v1312_v11 }
 0x678   : > { %1314 = vadd.xlane.f32.xlu1 %v1313_v12 }
 0x705   : > { %v1315_v13 = vpop.xlane.xlu1 %1314 }
 0x706   : > { %v1316_v14 = vmul.f32 0.03125, %v1315_v13 }
 0x708   : > { %v1317_v15 = vadd.f32 1e-05, %v1316_v14 }
 0x70a   : > { %1961 = vrsqrt.f32 %v1317_v15 }
 0x714   : > { %v1962_v22 = vpop.eup %1961 }
 0x715   : > { %v1319_v17 = vmul.f32 %v1962_v22, %v1312_v11 }
 0x717   : > { %v1327_v19 = vmul.f32 %v1587_v16, %v1319_v17 }
 0x719   : > { %v1335_v20 = vadd.f32 %v1588_v18, %v1327_v19 }
 0x71b   : > { %1336 = vst [vmem:[%s522_s3] sm:$0xff] %v1335_v20 }
 0x71c   : > { %2178 = shalt.err (!%p2175_p8)
}
 0x71d   : > { %s2179_s13 = scalar_lea.hbm %s2712_s18, 128  ;;  %s2183_s12 = scalar_lea.hbm %s2834_s21, 256 }
 0x71e   : > { %p2180_p10 = scmp.ne.s32.totalorder %s2712_s18, %s2179_s13  ;;  %p2184_p6 = scmp.lt.u32.totalorder %s2712_s18, %s2834_s21 }
 0x71f   : > { %p2185_p3 = scmp.lt.u32.totalorder %s2183_s12, %s2179_s13  ;;  %p2187_p2 = scmp.lt.u32.totalorder %s2179_s13, %s2712_s18 }
 0x720   : > { %p2181_p13 = pnand %p2180_p10, %p2835_p0 }
 0x721   : > { %p2186_p5 = por %p2185_p3, %p2184_p6 }
 0x722   : > { %p2182_p1 = pneg %p2181_p13 }
 0x723   : > { %p2188_p4 = por %p2187_p2, %p2186_p5 }
 0x725   : > { %p2189_p11 = pnand %p2188_p4, %p2182_p1 }
 0x727   : > { %2192 = shalt.err (!%p2189_p11)
}
 0x728   : > { %1829 = dma.vmem_to_hbm [thread:$0]  (%p2835_p0), %s2714_s22, 128, %s2712_s18, %s1338_s20  }
 0x729 PF: > { %s2836_s4 = sld [smem:[#allocation20_spill]]  ;;  %s2837_s11 = sld [smem:[#allocation22_spill]] }
 0x72a   : > { %p2839_p9 = scmp.ge.s32.totalorder %s2243_s16, 2 }
 0x72f   : > { %s1363_s1 = sand.u32 1, %s2836_s4   ;;  %p2838_p7 = scmp.ne.s32.totalorder %s2837_s11, 0 }
 0x730   : > { %s1364_s30 = scalar_lea.sflag [#allocation4], %s1363_s1 }
 0x731   : > { %p1855_p12 = pnand %p2839_p9, %p2838_p7 }
 0x733   : > { %2226 = dma.done.wait (!%p1855_p12), %s1364_s30, 128  }
 0x734   : > { %2228 = vsyncadd (!%p1855_p12), %s1364_s30, 4294967168  ;;  %s2840_s16 = sld [smem:[#allocation23_spill]]  ;;  %s2841_s29 = sld [smem:[#allocation21_spill]] }
 0x735   : > { %s2842_s15 = sld [smem:[#allocation25_spill]]  ;;  %s2843_s13 = smov %s2235_s14 }
 0x73a   : > { %p28_p8 = scmp.ge.s32.totalorder %s2840_s16, 4   ;;  %s2844_s14 = smov %s2841_s29 }
 0x73c   :  { %30 = sbr.rel (!%p28_p8) target bundleno = 17 (0x11), region = 148 }
 0x743   :  { %1369 = vsyncpa [#allocation3], 1 }
 0x744   :  { %1371 = vsyncpa [#allocation3 + $0x1], 1 }
 0x745   :  { %1372 = vsyncpa [#allocation6], 1 }
 0x746   :  { %1374 = vsyncpa [#allocation6 + $0x1], 1 }
 0x747   :  { %1375 = vsyncpa [#allocation9], 1 }
 0x748   :  { %1376 = vsyncpa [#allocation12], 1 }
 0x749   :  { %1377 = vsyncpa [#allocation4], 1 }
 0x74a   :  { %1379 = vsyncpa [#allocation4 + $0x1], 1 }

</bundles_post_ra>
